<compile_context>
chip_gen: v5e
topology: v5e:2x2
jax: 0.10.0
libtpu: 0.0.40
codegen_flags: <defaults>
</compile_context>

<pallas_src>
import functools

import jax
import jax.numpy as jnp
from jax.experimental import pallas as pl
from jax.experimental.pallas import tpu as pltpu

TEMP = 10.0


def _round_up(x, m):
    return ((x + m - 1) // m) * m


def _eca_kernel(x_ref, p_ref, lhard_ref, scores_ref):
    """Per-batch-tile hot path: scores = (X @ P)**2 @ L_hard."""
    psi = jnp.dot(x_ref[...], p_ref[...], preferred_element_type=jnp.float32)
    psi_sq = psi * psi
    scores_ref[...] = jnp.dot(psi_sq, lhard_ref[...],
                              preferred_element_type=jnp.float32)


@functools.partial(jax.jit, static_argnames=("tile_n",))
def eca_forward(X, A_raw, D, L_raw, *, tile_n=256):
    N, M = X.shape
    _, C = L_raw.shape

    # ---- plain-JAX parameter prep (independent of X, matches torch) ----
    A_skew = A_raw - A_raw.T
    A = A_skew + jnp.diag(D)
    P = jax.scipy.linalg.expm(A)          # torch.matrix_exp equivalent
    # TODO(synk): matrix_exp stays in JAX glue (Pade/scaling-squaring); it is
    # parameter-only prep, not the per-sample hot path.
    P_norm = P / jnp.linalg.norm(P, axis=0, keepdims=True)
    # sigmoid(TEMP*x) >= 0.5  <=>  x >= 0 (TEMP > 0): exact, no transcendental.
    # Forward value of the straight-through estimator is the hard threshold.
    # TODO(synk): STE backward ((L_hard - L).detach() + L) not implemented;
    # forward-only (no custom_vjp), so gradients would not match PyTorch.
    L_hard = (L_raw >= 0.0).astype(jnp.float32)

    # ---- pad to lane/sublane-aligned shapes (lane-dense stores) ----
    M_pad = _round_up(M, 128)
    C_pad = _round_up(C, 128)
    tile = min(_round_up(N, 8), _round_up(tile_n, 8))
    N_pad = _round_up(N, tile)

    X_p = jnp.pad(X.astype(jnp.float32), ((0, N_pad - N), (0, M_pad - M)))
    P_p = jnp.pad(P.astype(jnp.float32), ((0, M_pad - M), (0, M_pad - M)))
    L_p = jnp.pad(L_hard, ((0, M_pad - M), (0, C_pad - C)))

    grid = (N_pad // tile,)

    scores_pad = pl.pallas_call(
        _eca_kernel,
        out_shape=jax.ShapeDtypeStruct((N_pad, C_pad), jnp.float32),
        grid_spec=pltpu.PrefetchScalarGridSpec(
            num_scalar_prefetch=0,
            grid=grid,
            in_specs=[
                pl.BlockSpec((tile, M_pad), lambda i: (i, 0)),     # X tile
                pl.BlockSpec((M_pad, M_pad), lambda i: (0, 0)),    # P (invariant)
                pl.BlockSpec((M_pad, C_pad), lambda i: (0, 0)),    # L_hard (invariant)
            ],
            out_specs=pl.BlockSpec((tile, C_pad), lambda i: (i, 0)),
        ),
        compiler_params=pltpu.CompilerParams(
            # Batch axis is fully independent now -> shard across TCs on v7x.
            dimension_semantics=("parallel",),
        ),
    )(X_p, P_p, L_p)

    scores = scores_pad[:N, :C]
    return scores, P_norm, L_hard, A


def _reference(X, A_raw, D, L_raw):
    """Pure-JAX reference mirroring the PyTorch forward (forward values)."""
    A_skew = A_raw - A_raw.T
    A = A_skew + jnp.diag(D)
    P = jax.scipy.linalg.expm(A)
    P_norm = P / jnp.linalg.norm(P, axis=0, keepdims=True)
    psi = X @ P
    psi_sq = psi ** 2
    L_soft = jax.nn.sigmoid(TEMP * L_raw)
    L_hard = (L_soft >= 0.5).astype(jnp.float32)   # forward value of the STE
    scores = psi_sq @ L_hard
    return scores, P_norm, L_hard, A


if __name__ == "__main__":
    # Small shapes: batch N=16, feature dim M=16, num classes C=10.
    N, M, C = 16, 16, 10
    key = jax.random.PRNGKey(0)
    kx, ka, kd, kl = jax.random.split(key, 4)

    X = jax.random.normal(kx, (N, M), dtype=jnp.float32)
    # Module __init__ uses zeros; use small deterministic values so the
    # forward pass is non-trivial.
    A_raw = 0.1 * jax.random.normal(ka, (M, M), dtype=jnp.float32)
    D = 0.1 * jax.random.normal(kd, (M,), dtype=jnp.float32)
    L_raw = 0.5 * jax.random.normal(kl, (M, C), dtype=jnp.float32)

    scores, P_norm, L_hard, A = eca_forward(X, A_raw, D, L_raw)
    jax.block_until_ready((scores, P_norm, L_hard, A))

    # sanity check against the pure-JAX reference
    r_scores, r_Pn, r_L, r_A = _reference(X, A_raw, D, L_raw)
    assert jnp.allclose(scores, r_scores, rtol=1e-5, atol=1e-5)
    assert jnp.allclose(P_norm, r_Pn, rtol=1e-5, atol=1e-5)
    assert jnp.allclose(L_hard, r_L)
    assert jnp.allclose(A, r_A)

    print("KERNEL_OK")
</pallas_src>

<mosaic_0001>
module attributes {stable_mosaic.version = 11 : i64} {
  func.func @_eca_kernel(%arg0: i32, %arg1: memref<16x128xf32, #tpu.memory_space<vmem>>, %arg2: memref<128x128xf32, #tpu.memory_space<vmem>>, %arg3: memref<128x128xf32, #tpu.memory_space<vmem>>, %arg4: memref<16x128xf32, #tpu.memory_space<vmem>>) attributes {dimension_semantics = [#tpu.dimension_semantics<parallel>], iteration_bounds = array<i64: 1>, scalar_prefetch = 0 : i64, scratch_operands = 0 : i64, tpu.core_type = #tpu.core_type<tc>, window_params = [{transform_indices = @transform_0, window_bounds = array<i64: 16, 128>}, {pipeline_mode = #tpu.pipeline_mode<synchronous>, transform_indices = @transform_1, window_bounds = array<i64: 128, 128>}, {pipeline_mode = #tpu.pipeline_mode<synchronous>, transform_indices = @transform_2, window_bounds = array<i64: 128, 128>}, {transform_indices = @transform_3, window_bounds = array<i64: 16, 128>}]} {
    %c0 = arith.constant 0 : index
    %c0_0 = arith.constant 0 : index
    %0 = vector.load %arg1[%c0, %c0_0] : memref<16x128xf32, #tpu.memory_space<vmem>>, vector<16x128xf32>
    %c0_1 = arith.constant 0 : index
    %c0_2 = arith.constant 0 : index
    %1 = vector.load %arg2[%c0_1, %c0_2] : memref<128x128xf32, #tpu.memory_space<vmem>>, vector<128x128xf32>
    %cst = arith.constant dense<0.000000e+00> : vector<16x128xf32>
    %2 = tpu.matmul %0, %1, %cst {dimension_numbers = #tpu.dot_dimension_numbers<[1], [0], [0], [1], [0, 0, 1, 1], [], []>} : vector<16x128xf32>, vector<128x128xf32>, vector<16x128xf32> -> vector<16x128xf32>
    %3 = arith.mulf %2, %2 : vector<16x128xf32>
    %c0_3 = arith.constant 0 : index
    %c0_4 = arith.constant 0 : index
    %4 = vector.load %arg3[%c0_3, %c0_4] : memref<128x128xf32, #tpu.memory_space<vmem>>, vector<128x128xf32>
    %cst_5 = arith.constant dense<0.000000e+00> : vector<16x128xf32>
    %5 = tpu.matmul %3, %4, %cst_5 {dimension_numbers = #tpu.dot_dimension_numbers<[1], [0], [0], [1], [0, 0, 1, 1], [], []>} : vector<16x128xf32>, vector<128x128xf32>, vector<16x128xf32> -> vector<16x128xf32>
    %c0_6 = arith.constant 0 : index
    %c0_7 = arith.constant 0 : index
    %6 = vector.load %arg4[%c0_6, %c0_7] : memref<16x128xf32, #tpu.memory_space<vmem>>, vector<16x128xf32>
    tpu.vector_store %arg4[%c0_6, %c0_7], %5 {strides = array<i32>} : memref<16x128xf32, #tpu.memory_space<vmem>>, vector<16x128xf32>,
    return
  }
  func.func @transform_0(%arg0: i32) -> (i32, i32) {
    %c0_i32 = arith.constant 0 : i32
    %c0_i32_0 = arith.constant 0 : i32
    return %arg0, %c0_i32 : i32, i32
  }
  func.func @transform_1(%arg0: i32) -> (i32, i32) {
    %c0_i32 = arith.constant 0 : i32
    %c0_i32_0 = arith.constant 0 : i32
    %c0_i32_1 = arith.constant 0 : i32
    return %c0_i32, %c0_i32_0 : i32, i32
  }
  func.func @transform_2(%arg0: i32) -> (i32, i32) {
    %c0_i32 = arith.constant 0 : i32
    %c0_i32_0 = arith.constant 0 : i32
    %c0_i32_1 = arith.constant 0 : i32
    return %c0_i32, %c0_i32_0 : i32, i32
  }
  func.func @transform_3(%arg0: i32) -> (i32, i32) {
    %c0_i32 = arith.constant 0 : i32
    %c0_i32_0 = arith.constant 0 : i32
    return %arg0, %c0_i32 : i32, i32
  }
}

</mosaic_0001>

<bundles_post_ra>
// kernel: custom-call.11
= control target key start
LH: loop header
LB: loop body
LE: loop exit
PB: predicated region body
PF: predicated region fallthrough
CT: control target
= control target key end

     0   :  { %5 = vsyncpa [#allocation4], 0  ;;  %s888_s0 = inlined_call_operand.vmem [shape: f32[16,16], index: 0, kind: input, shape index: {}]   ;;  %s889_s1 = inlined_call_operand.vmem [shape: f32[16,16], index: 1, kind: output, shape index: {0}]   ;;  %s890_s2 = inlined_call_operand.hbm [shape: s32[16], index: 2, kind: output, shape index: {1}]   ;;  %s891_s3 = inlined_call_operand.vmem [shape: s32[16], index: 3, kind: output, shape index: {2}]  }
   0x1   :  { %s15_s14 = scalar_lea.vmem %s888_s0, 8 }
   0x2   :  { %p466_p0 = scmp.gt.s32.totalorder %s888_s0, %s15_s14 }
   0x3   :  { %s761_s17 = smov (!%p466_p0), [#allocation0]   ;;  %s765_s20 = smov (!%p466_p0), %s888_s0  }
   0x4   :  { %467 = sbr.rel (%p466_p0) target bundleno = 17 (0x11), region = 157 }
   0x9 LB: > { %v49_v0 = vld [vmem:[%s767_s20] sm:$0xff]  ;;  %s51_s20 = scalar_lea.vmem %s767_s20, 8   ;;  %s767_s20 = sphi %s765_s20, %s51_s20   ;;  %s763_s17 = sphi %s761_s17, %s52_s17  }
   0xa   : > { %50 = vst [vmem:[%s763_s17] sm:$0xff] %v49_v0  ;;  %s52_s17 = scalar_lea.vmem %s763_s17, 8   ;;  %p46_p1 = scmp.gt.s32.totalorder %s51_s20, %s15_s14 }
   0xc   :  { %48 = sbr.rel (!%p46_p1) target bundleno = 9 (0x9), region = 163 }
  0x11 PF:  { %v62_v1 = vld [vmem:[#allocation0] sm:$0xff]  ;;  %v66_v2 = vld [vmem:[#allocation0 + $0x8] sm:$0xff]  ;;  %v69_v3 = vlaneseq  ;;  %v785_v5 = vmov 0   ;;  %s769_s0 = smov 0  }
  0x12   :  { %63 = vst [vmem:[#allocation1] sm:$0xff] %v62_v1 }
  0x13   :  { %67 = vst [vmem:[#allocation1 + $0x8] sm:$0xff] %v66_v2  ;;  %v817_v4 = vshrl.u32 %v69_v3, 7 }
  0x14   :  { %68 = vst [vmem:[#allocation2] sm:$0x1] %v785_v5 }
  0x15 LB: > { %s524_s21 = sshll.u32 %s771_s0, 3  ;;  %s77_s0 = sadd.s32 1, %s771_s0   ;;  %s771_s0 = sphi %s769_s0, %s77_s0  }
  0x16   : > { %v81_v6 = vstv %s524_s21  ;;  %s79_s22 = scalar_lea.vmem [#allocation7], %s524_s21  ;;  %p74_p2 = scmp.ge.s32.totalorder %s77_s0, 2  }
  0x17   : > { %v82_v7 = vadd.s32 %v81_v6, %v817_v4  ;;  %s820_s23 = smov (%p74_p2), 0  }
  0x18   :  { %76 = sbr.rel (!%p74_p2) target bundleno = 21 (0x15), region = 174 }
  0x19   : > { %83 = vst [vmem:[%s79_s22] sm:$0xff] %v82_v7 }
  0x1d LB: > { %v94_v8 = vld [vmem:[#allocation1] sm:$0xff]  ;;  %v106_v9 = vld [vmem:[#allocation1 + $0x8] sm:$0xff]  ;;  %v826_v10 = vadd.s32 8, %v817_v4  ;;  %v829_v12 = vstv %s775_s23  ;;  %s152_s24 = ssub.s32 128, %s775_s23  ;;  %v840_v46 = vand.u32 127, %v69_v3  ;;  %s164_s26 = scalar_lea.vmem [#allocation1], %s775_s23  ;;  %s775_s23 = sphi %s820_s23, %s89_s23  }
  0x1e   : > { %v95_v11 = vand.u32 2147483647, %v94_v8  ;;  %v107_v13 = vand.u32 2147483647, %v106_v9  ;;  %vm98_vm0 = vcmp.ge.s32.totalorder %v817_v4, %v829_v12  ;;  %v161_v47 = vld [vmem:[#allocation2] ss:$0 sm:$0xff] }
  0x1f   : > { %vm110_vm3 = vcmp.ge.s32.totalorder %v826_v10, %v829_v12  ;;  %vm159_vm13 = vcmp.eq.s32.totalorder %v840_v46, %v829_v12  ;;  %v166_v48 = vld [vmem:[%s164_s26] ss:$0 sm:$0xff]  ;;  %s170_s28 = scalar_lea.vmem [#allocation7], %s775_s23  ;;  %vm218_vm15 = vcmp.gt.s32.totalorder %v826_v10, %v829_v12  ;;  %s89_s23 = sadd.s32 1, %s775_s23  }
  0x20   : > { %vm526_vm1 = vcmp.gt.f32.partialorder %v95_v11, -inf  ;;  %v172_v52 = vld [vmem:[%s170_s28] ss:$0 sm:$0xff]  ;;  %p86_p3 = scmp.ge.s32.totalorder %s89_s23, 16  }
  0x21   : > { %vm102_vm2 = vmand %vm98_vm0, %vm526_vm1  ;;  %vm190_vm0 = vcmp.gt.s32.totalorder %v817_v4, %v829_v12  ;;  %s777_s5 = smov (%p86_p3), %s889_s1   ;;  %s781_s6 = smov (%p86_p3), [#allocation1]  }
  0x22   : > { %v103_v14 = vsel %vm102_vm2, %v817_v4, %v829_v12  ;;  %v104_v15 = vsel %vm102_vm2, %v95_v11, -inf }
  0x23   : > { %vm113_vm4 = vcmp.lt.f32.partialorder %v104_v15, %v107_v13 }
  0x24   : > { %vm114_vm5 = vmand %vm110_vm3, %vm113_vm4 }
  0x25   : > { %v115_v16 = vsel %vm114_vm5, %v826_v10, %v103_v14  ;;  %v116_v17 = vsel %vm114_vm5, %v107_v13, %v104_v15 }
  0x26   : > { %v117_v18 = vrot.slane %v116_v17, 1  ;;  %v118_v19 = vrot.slane %v115_v16, 1 }
  0x28   : > { %vm119_vm6 = vcmp.ge.f32.partialorder %v117_v18, %v116_v17  ;;  %v122_v20 = vrot.slane %v117_v18, 1  ;;  %v123_v21 = vrot.slane %v118_v19, 1 }
  0x29   : > { %v120_v22 = vsel %vm119_vm6, %v117_v18, %v116_v17  ;;  %v121_v23 = vsel %vm119_vm6, %v118_v19, %v115_v16 }
  0x2a   : > { %vm124_vm7 = vcmp.ge.f32.partialorder %v122_v20, %v120_v22  ;;  %v127_v24 = vrot.slane %v122_v20, 1  ;;  %v128_v25 = vrot.slane %v123_v21, 1 }
  0x2b   : > { %v125_v26 = vsel %vm124_vm7, %v122_v20, %v120_v22  ;;  %v126_v27 = vsel %vm124_vm7, %v123_v21, %v121_v23 }
  0x2c   : > { %vm129_vm8 = vcmp.ge.f32.partialorder %v127_v24, %v125_v26  ;;  %v132_v28 = vrot.slane %v127_v24, 1  ;;  %v133_v29 = vrot.slane %v128_v25, 1 }
  0x2d   : > { %v130_v30 = vsel %vm129_vm8, %v127_v24, %v125_v26  ;;  %v131_v31 = vsel %vm129_vm8, %v128_v25, %v126_v27 }
  0x2e   : > { %vm134_vm9 = vcmp.ge.f32.partialorder %v132_v28, %v130_v30  ;;  %v137_v32 = vrot.slane %v132_v28, 1  ;;  %v138_v33 = vrot.slane %v133_v29, 1 }
  0x2f   : > { %v135_v34 = vsel %vm134_vm9, %v132_v28, %v130_v30  ;;  %v136_v35 = vsel %vm134_vm9, %v133_v29, %v131_v31  ;;  %vm235_vm9 = vmand %vm218_vm15, %vm159_vm13 }
  0x30   : > { %vm139_vm10 = vcmp.ge.f32.partialorder %v137_v32, %v135_v34  ;;  %v142_v36 = vrot.slane %v137_v32, 1  ;;  %v143_v37 = vrot.slane %v138_v33, 1 }
  0x31   : > { %v140_v38 = vsel %vm139_vm10, %v137_v32, %v135_v34  ;;  %v141_v39 = vsel %vm139_vm10, %v138_v33, %v136_v35 }
  0x32   : > { %vm144_vm11 = vcmp.ge.f32.partialorder %v142_v36, %v140_v38  ;;  %v147_v40 = vrot.slane %v142_v36, 1  ;;  %v148_v41 = vrot.slane %v143_v37, 1 }
  0x33   : > { %v145_v42 = vsel %vm144_vm11, %v142_v36, %v140_v38  ;;  %v146_v43 = vsel %vm144_vm11, %v143_v37, %v141_v39  ;;  %vm207_vm11 = vmand %vm190_vm0, %vm159_vm13 }
  0x34   : > { %vm149_vm12 = vcmp.ge.f32.partialorder %v147_v40, %v145_v42 }
  0x35   : > { %v151_v44 = vsel %vm149_vm12, %v148_v41, %v146_v43  ;;  %vm182_vm12 = vcmp.gt.s32.totalorder %v840_v46, %v829_v12 }
  0x36   : > { %153 = vrot.lane.b32.xlu0 %v151_v44, %s152_s24 }
  0xa8   : > { %v154_v45 = vpop.permute.xlu0 %153 }
  0xa9   : > { %534 = vpush %v154_v45 }
  0xda   : > { %s535_s25 = spop %534 }
  0xdb   : > { %v160_v49 = vstv %s535_s25  ;;  %s165_s27 = scalar_lea.vmem [#allocation1], %s535_s25  ;;  %s171_s29 = scalar_lea.vmem [#allocation7], %s535_s25 }
  0xdc   : > { %v162_v50 = vsel %vm159_vm13, %v160_v49, %v161_v47  ;;  %v167_v51 = vld [vmem:[%s165_s27] ss:$0 sm:$0xff] }
  0xdd   : > { %163 = vst [vmem:[#allocation2] sm:$0x1] %v162_v50  ;;  %v173_v53 = vld [vmem:[%s171_s29] ss:$0 sm:$0xff]  ;;  %vm176_vm14 = vcmp.ne.f32.partialorder %v167_v51, 0.0  ;;  %v183_v10 = vsel %vm182_vm12, %v167_v51, 0.0 }
  0xde   : > { %168 = vst [vmem:[%s165_s27] sm:$0x1] %v166_v48  ;;  %vm177_vm1 = vmand %vm159_vm13, %vm176_vm14 }
  0xdf   : > { %169 = vst [vmem:[%s164_s26] sm:$0x1] %v167_v51  ;;  %v178_v54 = vsel %vm177_vm1, %v167_v51, 1.0 }
  0xe0   : > { %174 = vst [vmem:[%s171_s29] sm:$0x1] %v172_v52  ;;  %v219_v55 = vsel %vm218_vm15, %v178_v54, 1.0  ;;  %v191_v56 = vsel %vm190_vm0, %v178_v54, 1.0 }
  0xe1   : > { %175 = vst [vmem:[%s170_s28] sm:$0x1] %v173_v53  ;;  %667 = vrcp.f32 %v219_v55  ;;  %v231_v62 = vand.u32 2147483648, %v219_v55  ;;  %v229_v1 = vand.u32 2147483647, %v219_v55  ;;  %v203_v2 = vand.u32 2147483648, %v191_v56 }
  0xe2   : > { %669 = vrcp.f32 %v191_v56  ;;  %v201_v6 = vand.u32 2147483647, %v191_v56  ;;  %vm225_vm4 = vweird.f32 %v219_v55  ;;  %vm197_vm6 = vweird.f32 %v191_v56 }
  0xe3   : > { %v232_v8 = vor.u32 1.1754944e-38, %v231_v62  ;;  %vm230_vm7 = vcmp.eq.f32.partialorder %v229_v1, 8.507059e+37  ;;  %v204_v13 = vor.u32 1.1754944e-38, %v203_v2 }
  0xe4   : > { %vm202_vm10 = vcmp.eq.f32.partialorder %v201_v6, 8.507059e+37  ;;  %v294_v12 = vld [vmem:[#allocation2] sm:$0x1] (%p86_p3) }
  0xe5   :  { %297 = vst [vmem:[#allocation3] sm:$0x1] (%p86_p3), %v294_v12 }
  0xe6   : > { %v215_v14 = vld [vmem:[#allocation1 + $0x8] sm:$0xff]  ;;  %v187_v18 = vld [vmem:[#allocation1] sm:$0xff] }
  0xe7   : > { %v668_v57 = vpop.eup %667 }
  0xe8   : > { %v670_v58 = vpop.eup %669  ;;  %v221_v59 = vmul.f32 %v668_v57, %v219_v55  ;;  %vm226_vm2 = vweird.f32 %v668_v57  ;;  %v242_v29 = vld [vmem:[#allocation7] sm:$0xff] (%p86_p3)  ;;  %v244_v30 = vld [vmem:[#allocation7 + $0x8] sm:$0xff] (%p86_p3) }
  0xe9   : > { %v193_v60 = vmul.f32 %v670_v58, %v191_v56  ;;  %vm198_vm3 = vweird.f32 %v670_v58  ;;  %vm227_vm5 = vmor %vm225_vm4, %vm226_vm2 }
  0xea   : > { %v222_v61 = vsub.f32 1.0, %v221_v59  ;;  %vm199_vm8 = vmor %vm197_vm6, %vm198_vm3 }
  0xeb   : > { %v194_v63 = vsub.f32 1.0, %v193_v60 }
  0xec   : > { %v223_v0 = vmul.f32 %v668_v57, %v222_v61 }
  0xed   : > { %v195_v5 = vmul.f32 %v670_v58, %v194_v63 }
  0xee   : > { %v224_v7 = vadd.f32 %v668_v57, %v223_v0 }
  0xef   : > { %v196_v9 = vadd.f32 %v670_v58, %v195_v5 }
  0xf0   : > { %v228_v11 = vsel %vm227_vm5, %v668_v57, %v224_v7 }
  0xf1   : > { %v233_v15 = vsel %vm230_vm7, %v232_v8, %v228_v11  ;;  %v200_v16 = vsel %vm199_vm8, %v670_v58, %v196_v9 }
  0xf2   : > { %v234_v17 = vmul.f32 %v233_v15, %v215_v14  ;;  %v205_v19 = vsel %vm202_vm10, %v204_v13, %v200_v16 }
  0xf3   : > { %v206_v20 = vmul.f32 %v205_v19, %v187_v18 }
  0xf4   : > { %v236_v21 = vsel %vm235_vm9, %v234_v17, 0.0 }
  0xf5   : > { %237 = vadd.xlane.f32.xlu1 %v236_v21  ;;  %v208_v22 = vsel %vm207_vm11, %v206_v20, 0.0 }
  0xf6   : > { %209 = vadd.xlane.f32.xlu0 %v208_v22 }
 0x11f   :  { %259 = vxpose.xlu0.b32.start [1/2] (short) (narrow) (%p86_p3), %v242_v29, 8 }
 0x127   :  { %260 = vxpose.xlu0.b32.end [2/2] (short) (narrow) (%p86_p3), %v244_v30, 8 }
 0x168   : > { %v238_v23 = vpop.xlane.xlu1 %237 }
 0x169   : > { %v239_v24 = vmul.f32 %v238_v23, %v183_v10  ;;  %v210_v25 = vpop.xlane.xlu0 %209 }
 0x16a   : > { %v211_v26 = vmul.f32 %v210_v25, %v183_v10  ;;  %88 = sbr.rel (!%p86_p3) target bundleno = 29 (0x1d), region = 185 }
 0x16b   : > { %v240_v27 = vsub.f32 %v234_v17, %v239_v24 }
 0x16c   : > { %v212_v28 = vsub.f32 %v206_v20, %v211_v26 }
 0x16d   : > { %241 = vst [vmem:[#allocation1 + $0x8] sm:$0xff] %v240_v27 }
 0x16e   : > { %213 = vst [vmem:[#allocation1] sm:$0xff] %v212_v28 }
 0x1c3   :  { %v275_v31 = vpop.trf.xlu0 }
 0x1c4   :  { %291 = vst [vmem:[#allocation5] sm:$0x1] %v275_v31 }
 0x1cb   :  { %v300_v32 = vld [vmem:[#allocation5] sm:$0x1] }
 0x1cc   :  { %303 = vst [vmem:[#allocation6] sm:$0x1] %v300_v32 }
 0x1cd LB: > { %v347_v33 = vld [vmem:[%s783_s6] sm:$0xff]  ;;  %s349_s6 = scalar_lea.vmem %s783_s6, 8   ;;  %s783_s6 = sphi %s781_s6, %s349_s6   ;;  %s779_s5 = sphi %s777_s5, %s350_s5  }
 0x1ce   : > { %348 = vst [vmem:[%s779_s5] sm:$0xff] %v347_v33  ;;  %s350_s5 = scalar_lea.vmem %s779_s5, 8   ;;  %p344_p4 = scmp.gt.s32.totalorder %s349_s6, [#allocation1 + $0x8] }
 0x1cf   :  { %s367_s9 = sshll.u32 (%p344_p4), %s890_s2, 4  ;;  %s786_s10 = smov (%p344_p4), [#allocation3]   ;;  %s368_s9 = int_to_ptr.hbm [resolvable:$true] %s367_s9 }
 0x1d0   :  { %346 = sbr.rel (!%p344_p4) target bundleno = 461 (0x1cd), region = 207  ;;  %s365_s1 = sshll.u32 (%p344_p4), %s786_s10, 4  ;;  %s366_s1 = int_to_ptr.vmem [resolvable:$true] %s365_s1 }
 0x1d1   :  { %370 = dma.vmem_to_hbm [thread:$0]  (%p344_p4), %s366_s1, 16, %s368_s9, [#allocation4]  }
 0x1d3   :  { %v427_v3 = vld [vmem:[#allocation6] sm:$0x1] (%p344_p4) }
 0x1d4   :  { %428 = vst [vmem:[%s891_s3] sm:$0x1] (%p344_p4), %v427_v3 }
 0x1d5   :  { %759 = dma.done.wait [#allocation4], 16  }
 0x1d6   :  { %760 = vsyncadd [#allocation4], 4294967280 }
 0x1d7   :  { %435 = vsyncpa [#allocation4], 1 }

// kernel: custom-call.12
= control target key start
LH: loop header
LB: loop body
LE: loop exit
PB: predicated region body
PF: predicated region fallthrough
CT: control target
= control target key end

     0   :  { %v39_v0 = vlaneseq  ;;  %v385_v19 = vmov -1.0   ;;  %s502_s0 = inlined_call_operand.vmem [shape: f32[1,16,16], index: 0, kind: input, shape index: {}]   ;;  %s503_s1 = inlined_call_operand.vmem [shape: f32[1,16,16], index: 1, kind: output, shape index: {}]  }
   0x1   :  { %v34_v3 = vld [vmem:[%s502_s0 + $0x8] sm:$0xff]  ;;  %v32_v35 = vld [vmem:[%s502_s0] sm:$0xff] }
   0x2   :  { %v397_v1 = vand.u32 127, %v39_v0  ;;  %v399_v2 = vshrl.u32 %v39_v0, 7 }
   0x4   :  { %v73_v4 = vadd.s32 8, %v399_v2  ;;  %vm41_vm1 = vcmp.lt.s32.totalorder %v397_v1, 16  ;;  %vm113_vm8 = vcmp.eq.s32.totalorder %v397_v1, 15  ;;  %vm121_vm10 = vcmp.eq.s32.totalorder %v397_v1, 14 }
   0x5   :  { %v114_v20 = vsel %vm113_vm8, 1.0, %v385_v19  ;;  %vm131_vm11 = vcmp.eq.s32.totalorder %v397_v1, 13  ;;  %vm45_vm12 = vcmp.eq.s32.totalorder %v399_v2, %v397_v1  ;;  %vm141_vm13 = vcmp.eq.s32.totalorder %v397_v1, 12 }
   0x6   :  { %vm74_vm0 = vcmp.eq.s32.totalorder %v73_v4, %v397_v1  ;;  %vm79_vm2 = vcmp.le.s32.totalorder %v73_v4, %v397_v1  ;;  %vm110_vm9 = vcmp.eq.s32.totalorder %v397_v1, %v73_v4  ;;  %v47_v36 = vsel %vm45_vm12, %v32_v35, 0.0 }
   0x7   :  { %v76_v5 = vsel %vm74_vm0, %v34_v3, 0.0  ;;  %vm80_vm3 = vmand %vm79_vm2, %vm41_vm1  ;;  %v115_v21 = vsel %vm110_vm9, %v114_v20, 0.0  ;;  %vm50_vm14 = vcmp.le.s32.totalorder %v399_v2, %v397_v1  ;;  %vm171_vm8 = vcmp.eq.s32.totalorder %v397_v1, 9 }
   0x8   :  { %77 = vadd.xlane.f32.xlu0 %v76_v5  ;;  %v81_v14 = vsel %vm80_vm3, %v34_v3, 0.0  ;;  %vm51_vm2 = vmand %vm50_vm14, %vm41_vm1  ;;  %vm161_vm1 = vcmp.eq.s32.totalorder %v397_v1, 10  ;;  %v386_v5 = vmov 0.0   ;;  %vm191_vm9 = vcmp.eq.s32.totalorder %v397_v1, 7 }
   0x9   :  { %v52_v51 = vsel %vm51_vm2, %v32_v35, 0.0  ;;  %vm219_vm12 = vcmp.eq.s32.totalorder %v397_v1, 5  ;;  %vm247_vm14 = vcmp.eq.s32.totalorder %v397_v1, 3  ;;  %vm275_vm2 = vcmp.eq.s32.totalorder %v397_v1, 1 }
  0x7b   :  { %v406_v6 = vpop.xlane.xlu0 %77 }
  0x7c   :  { %381 = vrcp.f32 %v406_v6  ;;  %v93_v10 = vand.u32 2147483648, %v406_v6  ;;  %v91_v12 = vand.u32 2147483647, %v406_v6  ;;  %vm87_vm5 = vweird.f32 %v406_v6 }
  0x7e   :  { %v94_v15 = vor.u32 1.1754944e-38, %v93_v10  ;;  %vm92_vm7 = vcmp.eq.f32.partialorder %v91_v12, 8.507059e+37 }
  0x82   :  { %v382_v7 = vpop.eup %381 }
  0x83   :  { %v83_v8 = vmul.f32 %v382_v7, %v406_v6  ;;  %vm88_vm4 = vweird.f32 %v382_v7 }
  0x84   :  { %vm89_vm6 = vmor %vm87_vm5, %vm88_vm4 }
  0x85   :  { %v84_v9 = vsub.f32 1.0, %v83_v8 }
  0x87   :  { %v85_v11 = vmul.f32 %v382_v7, %v84_v9 }
  0x89   :  { %v86_v13 = vadd.f32 %v382_v7, %v85_v11 }
  0x8b   :  { %v90_v16 = vsel %vm89_vm6, %v382_v7, %v86_v13  ;;  %vm151_vm6 = vcmp.eq.s32.totalorder %v397_v1, 11 }
  0x8c   :  { %v419_v17 = vsel %vm92_vm7, %v94_v15, %v90_v16  ;;  %vm103_vm7 = vcmp.eq.s32.totalorder %v397_v1, %v399_v2 }
  0x8d   :  { %v96_v18 = vmul.f32 %v419_v17, %v81_v14  ;;  %v104_v7 = vsel %vm103_vm7, -1.0, %v386_v5 }
  0x8f   :  { %97 = vst [vmem:[#allocation2 + $0x8] sm:$0xff] %v96_v18 }
  0x96   :  { %v117_v22 = vld [vmem:[#allocation2 + $0xe] ss:$0 sm:$0xff]  ;;  %v127_v25 = vld [vmem:[#allocation2 + $0xd] ss:$0 sm:$0xff]  ;;  %v137_v30 = vld [vmem:[#allocation2 + $0xc] ss:$0 sm:$0xff] }
  0x97   :  { %v118_v23 = vxor.u32 2147483648, %v117_v22  ;;  %v128_v27 = vxor.u32 2147483648, %v127_v25  ;;  %v138_v32 = vxor.u32 2147483648, %v137_v30  ;;  %v147_v37 = vld [vmem:[#allocation2 + $0xb] ss:$0 sm:$0xff] }
  0x98   :  { %v148_v39 = vxor.u32 2147483648, %v147_v37  ;;  %v157_v55 = vld [vmem:[#allocation2 + $0xa] ss:$0 sm:$0xff]  ;;  %v167_v60 = vld [vmem:[#allocation2 + $0x9] ss:$0 sm:$0xff] }
  0x99   :  { %v122_v24 = vmul.f32 %v118_v23, %v115_v21  ;;  %v158_v57 = vxor.u32 2147483648, %v157_v55  ;;  %v168_v62 = vxor.u32 2147483648, %v167_v60  ;;  %v177_v9 = vld [vmem:[#allocation2 + $0x8] ss:$0 sm:$0xff] }
  0x9a   :  { %v178_v11 = vxor.u32 2147483648, %v177_v9 }
  0x9b   :  { %123 = vadd.xlane.f32.xlu0 %v122_v24 }
 0x10e   :  { %v124_v26 = vpop.xlane.xlu0 %123 }
 0x10f   :  { %v125_v28 = vsel %vm121_vm10, %v124_v26, %v115_v21  ;;  %vm181_vm10 = vcmp.eq.s32.totalorder %v397_v1, 8 }
 0x110   :  { %v132_v29 = vmul.f32 %v128_v27, %v125_v28 }
 0x112   :  { %133 = vadd.xlane.f32.xlu1 %v132_v29 }
 0x185   :  { %v134_v31 = vpop.xlane.xlu1 %133 }
 0x186   :  { %v135_v33 = vsel %vm131_vm11, %v134_v31, %v125_v28  ;;  %vm205_vm11 = vcmp.eq.s32.totalorder %v397_v1, 6 }
 0x187   :  { %v142_v34 = vmul.f32 %v138_v32, %v135_v33 }
 0x189   :  { %143 = vadd.xlane.f32.xlu1 %v142_v34 }
 0x191   :  { %48 = vadd.xlane.f32.xlu1 %v47_v36 }
 0x1fc   :  { %v144_v38 = vpop.xlane.xlu1 %143 }
 0x1fd   :  { %v145_v40 = vsel %vm141_vm13, %v144_v38, %v135_v33  ;;  %vm233_vm13 = vcmp.eq.s32.totalorder %v397_v1, 4 }
 0x1fe   :  { %v152_v41 = vmul.f32 %v148_v39, %v145_v40 }
 0x200   :  { %153 = vadd.xlane.f32.xlu2 %v152_v41 }
 0x204   :  { %v432_v42 = vpop.xlane.xlu1 %48 }
 0x205   :  { %383 = vrcp.f32 %v432_v42  ;;  %v64_v45 = vand.u32 2147483648, %v432_v42  ;;  %vm58_vm15 = vweird.f32 %v432_v42  ;;  %v62_v47 = vand.u32 2147483647, %v432_v42 }
 0x207   :  { %v65_v49 = vor.u32 1.1754944e-38, %v64_v45  ;;  %vm63_vm4 = vcmp.eq.f32.partialorder %v62_v47, 8.507059e+37 }
 0x20b   :  { %v384_v43 = vpop.eup %383 }
 0x20c   :  { %v54_v44 = vmul.f32 %v384_v43, %v432_v42  ;;  %vm59_vm0 = vweird.f32 %v384_v43 }
 0x20d   :  { %vm60_vm3 = vmor %vm58_vm15, %vm59_vm0  ;;  %vm261_vm0 = vcmp.eq.s32.totalorder %v397_v1, 2 }
 0x20e   :  { %v55_v46 = vsub.f32 1.0, %v54_v44 }
 0x210   :  { %v56_v48 = vmul.f32 %v384_v43, %v55_v46 }
 0x212   :  { %v57_v50 = vadd.f32 %v384_v43, %v56_v48 }
 0x214   :  { %v61_v52 = vsel %vm60_vm3, %v384_v43, %v57_v50  ;;  %vm288_vm3 = vcmp.eq.s32.totalorder %v397_v1, 0 }
 0x215   :  { %v445_v53 = vsel %vm63_vm4, %v65_v49, %v61_v52 }
 0x216   :  { %v67_v54 = vmul.f32 %v445_v53, %v52_v51 }
 0x218   :  { %68 = vst [vmem:[#allocation2] sm:$0xff] %v67_v54 }
 0x21f   :  { %v187_v0 = vld [vmem:[#allocation2 + $0x7] ss:$0 sm:$0xff]  ;;  %v201_v14 = vld [vmem:[#allocation2 + $0x6] ss:$0 sm:$0xff]  ;;  %v215_v22 = vld [vmem:[#allocation2 + $0x5] ss:$0 sm:$0xff] }
 0x220   :  { %v188_v4 = vxor.u32 2147483648, %v187_v0  ;;  %v202_v15 = vxor.u32 2147483648, %v201_v14  ;;  %v216_v24 = vxor.u32 2147483648, %v215_v22  ;;  %v229_v30 = vld [vmem:[#allocation2 + $0x4] ss:$0 sm:$0xff] }
 0x221   :  { %v230_v32 = vxor.u32 2147483648, %v229_v30  ;;  %v243_v38 = vld [vmem:[#allocation2 + $0x3] ss:$0 sm:$0xff]  ;;  %v257_v47 = vld [vmem:[#allocation2 + $0x2] ss:$0 sm:$0xff] }
 0x222   :  { %v192_v8 = vmul.f32 %v188_v4, %v104_v7  ;;  %v258_v49 = vxor.u32 2147483648, %v257_v47  ;;  %v284_v0 = vld [vmem:[#allocation2] ss:$0 sm:$0xff] }
 0x273   :  { %v154_v56 = vpop.xlane.xlu2 %153 }
 0x274   :  { %v155_v58 = vsel %vm151_vm6, %v154_v56, %v145_v40  ;;  %v244_v40 = vxor.u32 2147483648, %v243_v38  ;;  %v271_v56 = vld [vmem:[#allocation2 + $0x1] ss:$0 sm:$0xff] }
 0x275   :  { %v162_v59 = vmul.f32 %v158_v57, %v155_v58 }
 0x277   :  { %163 = vadd.xlane.f32.xlu2 %v162_v59 }
 0x2ea   :  { %v164_v61 = vpop.xlane.xlu2 %163 }
 0x2eb   :  { %v165_v63 = vsel %vm161_vm1, %v164_v61, %v155_v58  ;;  %v272_v58 = vxor.u32 2147483648, %v271_v56 }
 0x2ec   :  { %v172_v3 = vmul.f32 %v168_v62, %v165_v63 }
 0x2ee   :  { %173 = vadd.xlane.f32.xlu0 %v172_v3 }
 0x2f6   :  { %193 = vadd.xlane.f32.xlu0 %v192_v8 }
 0x361   :  { %v174_v10 = vpop.xlane.xlu0 %173 }
 0x362   :  { %v175_v12 = vsel %vm171_vm8, %v174_v10, %v165_v63 }
 0x363   :  { %v182_v13 = vmul.f32 %v178_v11, %v175_v12 }
 0x365   :  { %183 = vadd.xlane.f32.xlu2 %v182_v13 }
 0x369   :  { %v194_v16 = vpop.xlane.xlu0 %193 }
 0x36a   :  { %v195_v2 = vsel %vm191_vm9, %v194_v16, %v104_v7 }
 0x36b   :  { %v206_v18 = vmul.f32 %v202_v15, %v195_v2 }
 0x36d   :  { %207 = vadd.xlane.f32.xlu2 %v206_v18 }
 0x3d8   :  { %v184_v19 = vpop.xlane.xlu2 %183 }
 0x3d9   :  { %v185_v20 = vsel %vm181_vm10, %v184_v19, %v175_v12 }
 0x3da   :  { %v196_v21 = vmul.f32 %v188_v4, %v185_v20  ;;  %v285_v4 = vxor.u32 2147483648, %v284_v0 }
 0x3dc   :  { %197 = vadd.xlane.f32.xlu1 %v196_v21 }
 0x3e0   :  { %v208_v23 = vpop.xlane.xlu2 %207 }
 0x3e1   :  { %v209_v25 = vsel %vm205_vm11, %v208_v23, %v195_v2 }
 0x3e2   :  { %v220_v26 = vmul.f32 %v216_v24, %v209_v25 }
 0x3e4   :  { %221 = vadd.xlane.f32.xlu1 %v220_v26 }
 0x44f   :  { %v198_v27 = vpop.xlane.xlu1 %197 }
 0x450   :  { %v199_v28 = vsel %vm191_vm9, %v198_v27, %v185_v20 }
 0x451   :  { %v210_v29 = vmul.f32 %v202_v15, %v199_v28 }
 0x453   :  { %211 = vadd.xlane.f32.xlu0 %v210_v29 }
 0x457   :  { %v222_v31 = vpop.xlane.xlu1 %221 }
 0x458   :  { %v223_v33 = vsel %vm219_vm12, %v222_v31, %v209_v25 }
 0x459   :  { %v234_v34 = vmul.f32 %v230_v32, %v223_v33 }
 0x45b   :  { %235 = vadd.xlane.f32.xlu0 %v234_v34 }
 0x4c6   :  { %v212_v35 = vpop.xlane.xlu0 %211 }
 0x4c7   :  { %v213_v36 = vsel %vm205_vm11, %v212_v35, %v199_v28 }
 0x4c8   :  { %v224_v37 = vmul.f32 %v216_v24, %v213_v36 }
 0x4ca   :  { %225 = vadd.xlane.f32.xlu2 %v224_v37 }
 0x4ce   :  { %v236_v39 = vpop.xlane.xlu0 %235 }
 0x4cf   :  { %v237_v41 = vsel %vm233_vm13, %v236_v39, %v223_v33 }
 0x4d0   :  { %v248_v43 = vmul.f32 %v244_v40, %v237_v41 }
 0x4d2   :  { %249 = vadd.xlane.f32.xlu2 %v248_v43 }
 0x53d   :  { %v226_v44 = vpop.xlane.xlu2 %225 }
 0x53e   :  { %v227_v45 = vsel %vm219_vm12, %v226_v44, %v213_v36 }
 0x53f   :  { %v238_v46 = vmul.f32 %v230_v32, %v227_v45 }
 0x541   :  { %239 = vadd.xlane.f32.xlu1 %v238_v46 }
 0x545   :  { %v250_v48 = vpop.xlane.xlu2 %249 }
 0x546   :  { %v251_v50 = vsel %vm247_vm14, %v250_v48, %v237_v41 }
 0x547   :  { %v262_v51 = vmul.f32 %v258_v49, %v251_v50 }
 0x549   :  { %263 = vadd.xlane.f32.xlu1 %v262_v51 }
 0x5b4   :  { %v240_v52 = vpop.xlane.xlu1 %239 }
 0x5b5   :  { %v241_v54 = vsel %vm233_vm13, %v240_v52, %v227_v45 }
 0x5b6   :  { %v252_v55 = vmul.f32 %v244_v40, %v241_v54 }
 0x5b8   :  { %253 = vadd.xlane.f32.xlu0 %v252_v55 }
 0x5bc   :  { %v264_v57 = vpop.xlane.xlu1 %263 }
 0x5bd   :  { %v265_v59 = vsel %vm261_vm0, %v264_v57, %v251_v50 }
 0x5be   :  { %v276_v60 = vmul.f32 %v272_v58, %v265_v59 }
 0x5c0   :  { %277 = vadd.xlane.f32.xlu0 %v276_v60 }
 0x62b   :  { %v254_v61 = vpop.xlane.xlu0 %253 }
 0x62c   :  { %v255_v62 = vsel %vm247_vm14, %v254_v61, %v241_v54 }
 0x62d   :  { %v266_v63 = vmul.f32 %v258_v49, %v255_v62 }
 0x62f   :  { %267 = vadd.xlane.f32.xlu2 %v266_v63 }
 0x633   :  { %v278_v3 = vpop.xlane.xlu0 %277 }
 0x634   :  { %v279_v5 = vsel %vm275_vm2, %v278_v3, %v265_v59 }
 0x635   :  { %v289_v7 = vmul.f32 %v285_v4, %v279_v5 }
 0x637   :  { %290 = vadd.xlane.f32.xlu2 %v289_v7 }
 0x6a2   :  { %v268_v8 = vpop.xlane.xlu2 %267 }
 0x6a3   :  { %v269_v9 = vsel %vm261_vm0, %v268_v8, %v255_v62 }
 0x6a4   :  { %v280_v10 = vmul.f32 %v272_v58, %v269_v9 }
 0x6a6   :  { %281 = vadd.xlane.f32.xlu1 %v280_v10 }
 0x6aa   :  { %v291_v11 = vpop.xlane.xlu2 %290 }
 0x6ab   :  { %v292_v12 = vsel %vm288_vm3, %v291_v11, %v279_v5 }
 0x6ac   :  { %v311_v13 = vmul.f32 %v292_v12, %v445_v53 }
 0x6ae   :  { %v313_v14 = vsel %vm58_vm15, %v292_v12, %v311_v13 }
 0x6af   :  { %365 = vst [vmem:[%s503_s1] sm:$0xff] %v313_v14 }
 0x719   :  { %v282_v15 = vpop.xlane.xlu1 %281 }
 0x71a   :  { %v283_v16 = vsel %vm275_vm2, %v282_v15, %v269_v9 }
 0x71b   :  { %v293_v2 = vmul.f32 %v285_v4, %v283_v16 }
 0x71d   :  { %294 = vadd.xlane.f32.xlu0 %v293_v2 }
 0x790   :  { %v295_v18 = vpop.xlane.xlu0 %294 }
 0x791   :  { %v296_v19 = vsel %vm288_vm3, %v295_v18, %v283_v16 }
 0x792   :  { %v329_v20 = vmul.f32 %v296_v19, %v419_v17 }
 0x794   :  { %v331_v53 = vsel %vm87_vm5, %v296_v19, %v329_v20 }
 0x795   :  { %367 = vst [vmem:[%s503_s1 + $0x8] sm:$0xff] %v331_v53 }

// kernel: custom-call.13
= control target key start
LH: loop header
LB: loop body
LE: loop exit
PB: predicated region body
PF: predicated region fallthrough
CT: control target
= control target key end

     0   :  { %v39_v0 = vlaneseq  ;;  %v386_v18 = vmov -1.0   ;;  %v387_v61 = vmov 0.0   ;;  %s469_s0 = inlined_call_operand.vmem [shape: f32[1,16,16], index: 0, kind: input, shape index: {}]   ;;  %s470_s1 = inlined_call_operand.vmem [shape: f32[1,16,16], index: 1, kind: output, shape index: {}]  }
   0x1   :  { %v32_v1 = vld [vmem:[%s469_s0] sm:$0xff]  ;;  %v34_v39 = vld [vmem:[%s469_s0 + $0x8] sm:$0xff] }
   0x2   :  { %v401_v2 = vand.u32 127, %v39_v0  ;;  %v43_v3 = vshrl.u32 %v39_v0, 7 }
   0x4   :  { %vm45_vm0 = vcmp.eq.s32.totalorder %v43_v3, %v401_v2  ;;  %vm41_vm1 = vcmp.lt.s32.totalorder %v401_v2, 16  ;;  %vm50_vm2 = vcmp.ge.s32.totalorder %v43_v3, %v401_v2  ;;  %vm106_vm8 = vcmp.eq.s32.totalorder %v401_v2, 0 }
   0x5   :  { %v47_v4 = vsel %vm45_vm0, %v32_v1, 0.0  ;;  %vm51_vm3 = vmand %vm50_vm2, %vm41_vm1  ;;  %vm103_vm9 = vcmp.eq.s32.totalorder %v401_v2, %v43_v3  ;;  %v107_v19 = vsel %vm106_vm8, 1.0, %v386_v18  ;;  %vm121_vm10 = vcmp.eq.s32.totalorder %v401_v2, 1 }
   0x6   :  { %48 = vadd.xlane.f32.xlu0 %v47_v4  ;;  %v52_v13 = vsel %vm51_vm3, %v32_v1, 0.0  ;;  %v108_v20 = vsel %vm103_vm9, %v107_v19, 0.0  ;;  %vm131_vm11 = vcmp.eq.s32.totalorder %v401_v2, 2  ;;  %vm141_vm12 = vcmp.eq.s32.totalorder %v401_v2, 3 }
   0x7   :  { %v73_v40 = vadd.s32 8, %v43_v3  ;;  %vm151_vm14 = vcmp.eq.s32.totalorder %v401_v2, 4  ;;  %vm161_vm8 = vcmp.eq.s32.totalorder %v401_v2, 5  ;;  %vm181_vm9 = vcmp.eq.s32.totalorder %v401_v2, 7 }
   0x9   :  { %vm74_vm13 = vcmp.eq.s32.totalorder %v73_v40, %v401_v2  ;;  %vm79_vm15 = vcmp.ge.s32.totalorder %v73_v40, %v401_v2 }
   0xa   :  { %v76_v41 = vsel %vm74_vm13, %v34_v39, 0.0  ;;  %vm80_vm3 = vmand %vm79_vm15, %vm41_vm1  ;;  %vm171_vm1 = vcmp.eq.s32.totalorder %v401_v2, 6  ;;  %vm233_vm13 = vcmp.eq.s32.totalorder %v401_v2, 11  ;;  %vm261_vm15 = vcmp.eq.s32.totalorder %v401_v2, 13 }
   0xb   :  { %v81_v56 = vsel %vm80_vm3, %v34_v39, 0.0  ;;  %vm289_vm3 = vcmp.eq.s32.totalorder %v401_v2, 15 }
  0x79   :  { %v404_v5 = vpop.xlane.xlu0 %48 }
  0x7a   :  { %382 = vrcp.f32 %v404_v5  ;;  %v64_v9 = vand.u32 2147483648, %v404_v5  ;;  %v62_v11 = vand.u32 2147483647, %v404_v5  ;;  %vm58_vm5 = vweird.f32 %v404_v5 }
  0x7c   :  { %v65_v14 = vor.u32 1.1754944e-38, %v64_v9  ;;  %vm63_vm7 = vcmp.eq.f32.partialorder %v62_v11, 8.507059e+37 }
  0x80   :  { %v383_v6 = vpop.eup %382 }
  0x81   :  { %v54_v7 = vmul.f32 %v383_v6, %v404_v5  ;;  %vm59_vm4 = vweird.f32 %v383_v6 }
  0x82   :  { %vm60_vm6 = vmor %vm58_vm5, %vm59_vm4 }
  0x83   :  { %v55_v8 = vsub.f32 1.0, %v54_v7 }
  0x85   :  { %v56_v10 = vmul.f32 %v383_v6, %v55_v8 }
  0x87   :  { %v57_v12 = vadd.f32 %v383_v6, %v56_v10 }
  0x89   :  { %v61_v15 = vsel %vm60_vm6, %v383_v6, %v57_v12 }
  0x8a   :  { %v417_v16 = vsel %vm63_vm7, %v65_v14, %v61_v15  ;;  %vm114_vm7 = vcmp.eq.s32.totalorder %v401_v2, %v73_v40 }
  0x8b   :  { %v67_v17 = vmul.f32 %v417_v16, %v52_v13  ;;  %v115_v62 = vsel %vm114_vm7, -1.0, %v387_v61 }
  0x8d   :  { %68 = vst [vmem:[#allocation2] sm:$0xff] %v67_v17 }
  0x94   :  { %v117_v21 = vld [vmem:[#allocation2 + $0x1] ss:$0 sm:$0xff]  ;;  %v127_v24 = vld [vmem:[#allocation2 + $0x2] ss:$0 sm:$0xff]  ;;  %v137_v29 = vld [vmem:[#allocation2 + $0x3] ss:$0 sm:$0xff] }
  0x95   :  { %v118_v22 = vxor.u32 2147483648, %v117_v21  ;;  %v128_v26 = vxor.u32 2147483648, %v127_v24  ;;  %v138_v31 = vxor.u32 2147483648, %v137_v29  ;;  %v147_v34 = vld [vmem:[#allocation2 + $0x4] ss:$0 sm:$0xff] }
  0x96   :  { %v148_v36 = vxor.u32 2147483648, %v147_v34  ;;  %v157_v42 = vld [vmem:[#allocation2 + $0x5] ss:$0 sm:$0xff]  ;;  %v167_v60 = vld [vmem:[#allocation2 + $0x6] ss:$0 sm:$0xff] }
  0x97   :  { %v122_v23 = vmul.f32 %v118_v22, %v108_v20  ;;  %v158_v44 = vxor.u32 2147483648, %v157_v42  ;;  %v168_v1 = vxor.u32 2147483648, %v167_v60  ;;  %v177_v8 = vld [vmem:[#allocation2 + $0x7] ss:$0 sm:$0xff] }
  0x98   :  { %v178_v10 = vxor.u32 2147483648, %v177_v8 }
  0x99   :  { %123 = vadd.xlane.f32.xlu0 %v122_v23 }
 0x10c   :  { %v124_v25 = vpop.xlane.xlu0 %123 }
 0x10d   :  { %v125_v27 = vsel %vm121_vm10, %v124_v25, %v108_v20  ;;  %vm191_vm10 = vcmp.eq.s32.totalorder %v401_v2, 8 }
 0x10e   :  { %v132_v28 = vmul.f32 %v128_v26, %v125_v27 }
 0x110   :  { %133 = vadd.xlane.f32.xlu1 %v132_v28 }
 0x183   :  { %v134_v30 = vpop.xlane.xlu1 %133 }
 0x184   :  { %v135_v32 = vsel %vm131_vm11, %v134_v30, %v125_v27  ;;  %vm205_vm11 = vcmp.eq.s32.totalorder %v401_v2, 9 }
 0x185   :  { %v142_v33 = vmul.f32 %v138_v31, %v135_v32 }
 0x187   :  { %143 = vadd.xlane.f32.xlu1 %v142_v33 }
 0x18f   :  { %77 = vadd.xlane.f32.xlu1 %v76_v41 }
 0x1fa   :  { %v144_v35 = vpop.xlane.xlu1 %143 }
 0x1fb   :  { %v145_v37 = vsel %vm141_vm12, %v144_v35, %v135_v32  ;;  %vm219_vm12 = vcmp.eq.s32.totalorder %v401_v2, 10 }
 0x1fc   :  { %v152_v38 = vmul.f32 %v148_v36, %v145_v37 }
 0x1fe   :  { %153 = vadd.xlane.f32.xlu2 %v152_v38 }
 0x202   :  { %v430_v47 = vpop.xlane.xlu1 %77 }
 0x203   :  { %384 = vrcp.f32 %v430_v47  ;;  %v93_v50 = vand.u32 2147483648, %v430_v47  ;;  %vm87_vm0 = vweird.f32 %v430_v47  ;;  %v91_v52 = vand.u32 2147483647, %v430_v47 }
 0x205   :  { %v94_v54 = vor.u32 1.1754944e-38, %v93_v50  ;;  %vm92_vm6 = vcmp.eq.f32.partialorder %v91_v52, 8.507059e+37 }
 0x209   :  { %v385_v48 = vpop.eup %384 }
 0x20a   :  { %v83_v49 = vmul.f32 %v385_v48, %v430_v47  ;;  %vm88_vm2 = vweird.f32 %v385_v48 }
 0x20b   :  { %vm89_vm4 = vmor %vm87_vm0, %vm88_vm2  ;;  %vm275_vm2 = vcmp.eq.s32.totalorder %v401_v2, 14 }
 0x20c   :  { %v84_v51 = vsub.f32 1.0, %v83_v49 }
 0x20e   :  { %v85_v53 = vmul.f32 %v385_v48, %v84_v51 }
 0x210   :  { %v86_v55 = vadd.f32 %v385_v48, %v85_v53 }
 0x212   :  { %v90_v57 = vsel %vm89_vm4, %v385_v48, %v86_v55 }
 0x213   :  { %v442_v58 = vsel %vm92_vm6, %v94_v54, %v90_v57 }
 0x214   :  { %v96_v59 = vmul.f32 %v442_v58, %v81_v56 }
 0x216   :  { %97 = vst [vmem:[#allocation2 + $0x8] sm:$0xff] %v96_v59 }
 0x21d   :  { %v187_v63 = vld [vmem:[#allocation2 + $0x8] ss:$0 sm:$0xff]  ;;  %v201_v17 = vld [vmem:[#allocation2 + $0x9] ss:$0 sm:$0xff]  ;;  %v215_v25 = vld [vmem:[#allocation2 + $0xa] ss:$0 sm:$0xff] }
 0x21e   :  { %v188_v3 = vxor.u32 2147483648, %v187_v63  ;;  %v202_v19 = vxor.u32 2147483648, %v201_v17  ;;  %v216_v27 = vxor.u32 2147483648, %v215_v25  ;;  %v229_v33 = vld [vmem:[#allocation2 + $0xb] ss:$0 sm:$0xff] }
 0x21f   :  { %v230_v35 = vxor.u32 2147483648, %v229_v33  ;;  %v243_v41 = vld [vmem:[#allocation2 + $0xc] ss:$0 sm:$0xff]  ;;  %v257_v50 = vld [vmem:[#allocation2 + $0xd] ss:$0 sm:$0xff] }
 0x220   :  { %v196_v7 = vmul.f32 %v188_v3, %v115_v62  ;;  %v258_v52 = vxor.u32 2147483648, %v257_v50  ;;  %v271_v59 = vld [vmem:[#allocation2 + $0xe] ss:$0 sm:$0xff] }
 0x221   :  { %v272_v61 = vxor.u32 2147483648, %v271_v59 }
 0x222   :  { %197 = vadd.xlane.f32.xlu1 %v196_v7 }
 0x271   :  { %v154_v43 = vpop.xlane.xlu2 %153 }
 0x272   :  { %v155_v45 = vsel %vm151_vm14, %v154_v43, %v145_v37  ;;  %v244_v43 = vxor.u32 2147483648, %v243_v41  ;;  %vm247_vm14 = vcmp.eq.s32.totalorder %v401_v2, 12 }
 0x273   :  { %v162_v46 = vmul.f32 %v158_v44, %v155_v45 }
 0x275   :  { %163 = vadd.xlane.f32.xlu2 %v162_v46 }
 0x295   :  { %v198_v18 = vpop.xlane.xlu1 %197 }
 0x296   :  { %v199_v20 = vsel %vm191_vm10, %v198_v18, %v115_v62 }
 0x297   :  { %v210_v21 = vmul.f32 %v202_v19, %v199_v20 }
 0x2e8   :  { %v164_v0 = vpop.xlane.xlu2 %163 }
 0x2e9   :  { %v165_v4 = vsel %vm161_vm8, %v164_v0, %v155_v45 }
 0x2ea   :  { %v172_v6 = vmul.f32 %v168_v1, %v165_v4 }
 0x2ec   :  { %173 = vadd.xlane.f32.xlu0 %v172_v6 }
 0x35f   :  { %v174_v9 = vpop.xlane.xlu0 %173 }
 0x360   :  { %v175_v11 = vsel %vm171_vm1, %v174_v9, %v165_v4  ;;  %v285_v4 = vld [vmem:[#allocation2 + $0xf] ss:$0 sm:$0xff] }
 0x361   :  { %v182_v12 = vmul.f32 %v178_v10, %v175_v11  ;;  %v286_v7 = vxor.u32 2147483648, %v285_v4 }
 0x363   :  { %183 = vadd.xlane.f32.xlu2 %v182_v12 }
 0x3d6   :  { %v184_v13 = vpop.xlane.xlu2 %183 }
 0x3d7   :  { %v185_v14 = vsel %vm181_vm9, %v184_v13, %v175_v11 }
 0x3d8   :  { %v192_v15 = vmul.f32 %v188_v3, %v185_v14 }
 0x3da   :  { %193 = vadd.xlane.f32.xlu0 %v192_v15 }
 0x3e2   :  { %211 = vadd.xlane.f32.xlu0 %v210_v21 }
 0x44d   :  { %v194_v22 = vpop.xlane.xlu0 %193 }
 0x44e   :  { %v195_v23 = vsel %vm191_vm10, %v194_v22, %v185_v14 }
 0x44f   :  { %v206_v24 = vmul.f32 %v202_v19, %v195_v23 }
 0x451   :  { %207 = vadd.xlane.f32.xlu2 %v206_v24 }
 0x455   :  { %v212_v26 = vpop.xlane.xlu0 %211 }
 0x456   :  { %v213_v28 = vsel %vm205_vm11, %v212_v26, %v199_v20 }
 0x457   :  { %v224_v29 = vmul.f32 %v216_v27, %v213_v28 }
 0x459   :  { %225 = vadd.xlane.f32.xlu2 %v224_v29 }
 0x4c4   :  { %v208_v30 = vpop.xlane.xlu2 %207 }
 0x4c5   :  { %v209_v31 = vsel %vm205_vm11, %v208_v30, %v195_v23 }
 0x4c6   :  { %v220_v32 = vmul.f32 %v216_v27, %v209_v31 }
 0x4c8   :  { %221 = vadd.xlane.f32.xlu1 %v220_v32 }
 0x4cc   :  { %v226_v34 = vpop.xlane.xlu2 %225 }
 0x4cd   :  { %v227_v36 = vsel %vm219_vm12, %v226_v34, %v213_v28 }
 0x4ce   :  { %v238_v37 = vmul.f32 %v230_v35, %v227_v36 }
 0x4d0   :  { %239 = vadd.xlane.f32.xlu1 %v238_v37 }
 0x53b   :  { %v222_v38 = vpop.xlane.xlu1 %221 }
 0x53c   :  { %v223_v39 = vsel %vm219_vm12, %v222_v38, %v209_v31 }
 0x53d   :  { %v234_v40 = vmul.f32 %v230_v35, %v223_v39 }
 0x53f   :  { %235 = vadd.xlane.f32.xlu0 %v234_v40 }
 0x543   :  { %v240_v42 = vpop.xlane.xlu1 %239 }
 0x544   :  { %v241_v44 = vsel %vm233_vm13, %v240_v42, %v227_v36 }
 0x545   :  { %v252_v45 = vmul.f32 %v244_v43, %v241_v44 }
 0x547   :  { %253 = vadd.xlane.f32.xlu0 %v252_v45 }
 0x5b2   :  { %v236_v46 = vpop.xlane.xlu0 %235 }
 0x5b3   :  { %v237_v48 = vsel %vm233_vm13, %v236_v46, %v223_v39 }
 0x5b4   :  { %v248_v49 = vmul.f32 %v244_v43, %v237_v48 }
 0x5b6   :  { %249 = vadd.xlane.f32.xlu2 %v248_v49 }
 0x5ba   :  { %v254_v51 = vpop.xlane.xlu0 %253 }
 0x5bb   :  { %v255_v53 = vsel %vm247_vm14, %v254_v51, %v241_v44 }
 0x5bc   :  { %v266_v54 = vmul.f32 %v258_v52, %v255_v53 }
 0x5be   :  { %267 = vadd.xlane.f32.xlu2 %v266_v54 }
 0x629   :  { %v250_v55 = vpop.xlane.xlu2 %249 }
 0x62a   :  { %v251_v56 = vsel %vm247_vm14, %v250_v55, %v237_v48 }
 0x62b   :  { %v262_v57 = vmul.f32 %v258_v52, %v251_v56 }
 0x62d   :  { %263 = vadd.xlane.f32.xlu1 %v262_v57 }
 0x631   :  { %v268_v60 = vpop.xlane.xlu2 %267 }
 0x632   :  { %v269_v62 = vsel %vm261_vm15, %v268_v60, %v255_v53 }
 0x633   :  { %v280_v63 = vmul.f32 %v272_v61, %v269_v62 }
 0x635   :  { %281 = vadd.xlane.f32.xlu1 %v280_v63 }
 0x6a0   :  { %v264_v0 = vpop.xlane.xlu1 %263 }
 0x6a1   :  { %v265_v1 = vsel %vm261_vm15, %v264_v0, %v251_v56 }
 0x6a2   :  { %v276_v3 = vmul.f32 %v272_v61, %v265_v1 }
 0x6a4   :  { %277 = vadd.xlane.f32.xlu0 %v276_v3 }
 0x6a8   :  { %v282_v6 = vpop.xlane.xlu1 %281 }
 0x6a9   :  { %v283_v8 = vsel %vm275_vm2, %v282_v6, %v269_v62 }
 0x6aa   :  { %v294_v9 = vmul.f32 %v286_v7, %v283_v8 }
 0x6ac   :  { %295 = vadd.xlane.f32.xlu0 %v294_v9 }
 0x717   :  { %v278_v10 = vpop.xlane.xlu0 %277 }
 0x718   :  { %v279_v11 = vsel %vm275_vm2, %v278_v10, %v265_v1 }
 0x719   :  { %v290_v12 = vmul.f32 %v286_v7, %v279_v11 }
 0x71b   :  { %291 = vadd.xlane.f32.xlu2 %v290_v12 }
 0x71f   :  { %v296_v13 = vpop.xlane.xlu0 %295 }
 0x720   :  { %v297_v14 = vsel %vm289_vm3, %v296_v13, %v283_v8 }
 0x721   :  { %v330_v15 = vmul.f32 %v297_v14, %v442_v58 }
 0x723   :  { %v332_v17 = vsel %vm87_vm0, %v297_v14, %v330_v15 }
 0x724   :  { %368 = vst [vmem:[%s470_s1 + $0x8] sm:$0xff] %v332_v17 }
 0x78e   :  { %v292_v18 = vpop.xlane.xlu2 %291 }
 0x78f   :  { %v293_v19 = vsel %vm289_vm3, %v292_v18, %v279_v11 }
 0x790   :  { %v312_v20 = vmul.f32 %v293_v19, %v417_v16 }
 0x792   :  { %v314_v21 = vsel %vm58_vm5, %v293_v19, %v312_v20 }
 0x793   :  { %366 = vst [vmem:[%s470_s1] sm:$0xff] %v314_v21 }

// kernel: eca_forward.1
= control target key start
LH: loop header
LB: loop body
LE: loop exit
PB: predicated region body
PF: predicated region fallthrough
CT: control target
= control target key end

     0   :  { %s306_s0 = inlined_call_operand.vmem [shape: f32[16,128], index: 0, kind: input, shape index: {}]   ;;  %s307_s1 = inlined_call_operand.vmem [shape: f32[128,128], index: 1, kind: input, shape index: {}]   ;;  %s308_s2 = inlined_call_operand.vmem [shape: f32[128,128], index: 2, kind: input, shape index: {}]   ;;  %s309_s3 = inlined_call_operand.hbm [shape: f32[16,128], index: 3, kind: output, shape index: {}]  }
   0x1   :  { %v32_v0 = vld [vmem:[%s307_s1 + $0x78] sm:$0xff]  ;;  %v31_v1 = vld [vmem:[%s307_s1 + $0x70] sm:$0xff]  ;;  %v30_v2 = vld [vmem:[%s307_s1 + $0x68] sm:$0xff] }
   0x2   :  { %117 = vmatpush.msra.mxu2 %v32_v0  ;;  %33 = vmatpush.msra.mxu0 %v32_v0  ;;  %v29_v3 = vld [vmem:[%s307_s1 + $0x60] sm:$0xff]  ;;  %v28_v4 = vld [vmem:[%s307_s1 + $0x58] sm:$0xff]  ;;  %v72_v6 = vld [vmem:[%s308_s2 + $0x70] sm:$0xff] }
   0x3   :  { %v73_v5 = vld [vmem:[%s308_s2 + $0x78] sm:$0xff]  ;;  %v27_v7 = vld [vmem:[%s307_s1 + $0x50] sm:$0xff]  ;;  %v71_v8 = vld [vmem:[%s308_s2 + $0x68] sm:$0xff] }
   0x4   :  { %118 = vmatpush.msra.mxu2 %v31_v1  ;;  %34 = vmatpush.msra.mxu0 %v31_v1  ;;  %v26_v9 = vld [vmem:[%s307_s1 + $0x48] sm:$0xff] }
   0x5   :  { %133 = vmatpush.msra.mxu3 %v73_v5  ;;  %74 = vmatpush.msra.mxu1 %v73_v5 }
   0x6   :  { %119 = vmatpush.msra.mxu2 %v30_v2  ;;  %35 = vmatpush.msra.mxu0 %v30_v2 }
   0x7   :  { %134 = vmatpush.msra.mxu3 %v72_v6  ;;  %75 = vmatpush.msra.mxu1 %v72_v6 }
   0x8   :  { %120 = vmatpush.msra.mxu2 %v29_v3  ;;  %36 = vmatpush.msra.mxu0 %v29_v3 }
   0xa   :  { %121 = vmatpush.msra.mxu2 %v28_v4  ;;  %37 = vmatpush.msra.mxu0 %v28_v4 }
   0xb   :  { %8 = vsyncpa [#allocation3], 0  ;;  %v70_v10 = vld [vmem:[%s308_s2 + $0x60] sm:$0xff]  ;;  %135 = vmatpush.msra.mxu3 %v71_v8  ;;  %76 = vmatpush.msra.mxu1 %v71_v8  ;;  %v69_v12 = vld [vmem:[%s308_s2 + $0x58] sm:$0xff]  ;;  %s178_s24 = smov [#allocation2]   ;;  %s105_s28 = sshll.u32 %s309_s3, 4  ;;  %s106_s28 = int_to_ptr.hbm [resolvable:$true] %s105_s28 }
   0xc   :  { %122 = vmatpush.msra.mxu2 %v27_v7  ;;  %38 = vmatpush.msra.mxu0 %v27_v7  ;;  %v25_v11 = vld [vmem:[%s307_s1 + $0x40] sm:$0xff]  ;;  %v24_v13 = vld [vmem:[%s307_s1 + $0x38] sm:$0xff]  ;;  %v68_v14 = vld [vmem:[%s308_s2 + $0x50] sm:$0xff]  ;;  %s103_s25 = sshll.u32 %s178_s24, 4  ;;  %s180_s29 = smov 8   ;;  %s104_s25 = int_to_ptr.vmem [resolvable:$true] %s103_s25 }
   0xd   :  { %136 = vmatpush.msra.mxu3 %v70_v10  ;;  %77 = vmatpush.msra.mxu1 %v70_v10  ;;  %v23_v15 = vld [vmem:[%s307_s1 + $0x30] sm:$0xff]  ;;  %v67_v16 = vld [vmem:[%s308_s2 + $0x48] sm:$0xff]  ;;  %v66_v18 = vld [vmem:[%s308_s2 + $0x40] sm:$0xff] }
   0xe   :  { %123 = vmatpush.msra.mxu2 %v26_v9  ;;  %39 = vmatpush.msra.mxu0 %v26_v9  ;;  %v22_v17 = vld [vmem:[%s307_s1 + $0x28] sm:$0xff]  ;;  %v21_v19 = vld [vmem:[%s307_s1 + $0x20] sm:$0xff]  ;;  %v65_v20 = vld [vmem:[%s308_s2 + $0x38] sm:$0xff] }
   0xf   :  { %137 = vmatpush.msra.mxu3 %v69_v12  ;;  %78 = vmatpush.msra.mxu1 %v69_v12  ;;  %v20_v21 = vld [vmem:[%s307_s1 + $0x18] sm:$0xff]  ;;  %v64_v22 = vld [vmem:[%s308_s2 + $0x30] sm:$0xff]  ;;  %v63_v24 = vld [vmem:[%s308_s2 + $0x28] sm:$0xff] }
  0x10   :  { %124 = vmatpush.msra.mxu2 %v25_v11  ;;  %40 = vmatpush.msra.mxu0 %v25_v11  ;;  %v19_v23 = vld [vmem:[%s307_s1 + $0x10] sm:$0xff]  ;;  %v18_v25 = vld [vmem:[%s307_s1 + $0x8] sm:$0xff]  ;;  %v62_v26 = vld [vmem:[%s308_s2 + $0x20] sm:$0xff] }
  0x11   :  { %138 = vmatpush.msra.mxu3 %v68_v14  ;;  %79 = vmatpush.msra.mxu1 %v68_v14  ;;  %v17_v27 = vld [vmem:[%s307_s1] sm:$0xff]  ;;  %v16_v28 = vld [vmem:[%s306_s0 + $0x8] sm:$0xff]  ;;  %v61_v30 = vld [vmem:[%s308_s2 + $0x18] sm:$0xff] }
  0x12   :  { %125 = vmatpush.msra.mxu2 %v24_v13  ;;  %41 = vmatpush.msra.mxu0 %v24_v13  ;;  %v15_v29 = vld [vmem:[%s306_s0] sm:$0xff]  ;;  %v60_v31 = vld [vmem:[%s308_s2 + $0x10] sm:$0xff]  ;;  %v59_v32 = vld [vmem:[%s308_s2 + $0x8] sm:$0xff] }
  0x13   :  { %139 = vmatpush.msra.mxu3 %v67_v16  ;;  %80 = vmatpush.msra.mxu1 %v67_v16  ;;  %v58_v33 = vld [vmem:[%s308_s2] sm:$0xff]  ;;  %s179_s2 = smov 128  }
  0x14   :  { %126 = vmatpush.msra.mxu2 %v23_v15  ;;  %42 = vmatpush.msra.mxu0 %v23_v15 }
  0x15   :  { %140 = vmatpush.msra.mxu3 %v66_v18  ;;  %81 = vmatpush.msra.mxu1 %v66_v18 }
  0x16   :  { %127 = vmatpush.msra.mxu2 %v22_v17  ;;  %43 = vmatpush.msra.mxu0 %v22_v17 }
  0x17   :  { %141 = vmatpush.msra.mxu3 %v65_v20  ;;  %82 = vmatpush.msra.mxu1 %v65_v20 }
  0x18   :  { %128 = vmatpush.msra.mxu2 %v21_v19  ;;  %44 = vmatpush.msra.mxu0 %v21_v19 }
  0x19   :  { %142 = vmatpush.msra.mxu3 %v64_v22  ;;  %83 = vmatpush.msra.mxu1 %v64_v22 }
  0x1a   :  { %129 = vmatpush.msra.mxu2 %v20_v21  ;;  %45 = vmatpush.msra.mxu0 %v20_v21 }
  0x1b   :  { %143 = vmatpush.msra.mxu3 %v63_v24  ;;  %84 = vmatpush.msra.mxu1 %v63_v24 }
  0x1c   :  { %130 = vmatpush.msra.mxu2 %v19_v23  ;;  %46 = vmatpush.msra.mxu0 %v19_v23 }
  0x1d   :  { %144 = vmatpush.msra.mxu3 %v62_v26  ;;  %85 = vmatpush.msra.mxu1 %v62_v26 }
  0x1e   :  { %131 = vmatpush.msra.mxu2 %v18_v25  ;;  %47 = vmatpush.msra.mxu0 %v18_v25 }
  0x1f   :  { %145 = vmatpush.msra.mxu3 %v61_v30  ;;  %86 = vmatpush.msra.mxu1 %v61_v30 }
  0x20   :  { %132 = vmatpush.msra.mxu2 %v17_v27  ;;  %48 = vmatpush.msra.mxu0 %v17_v27 }
  0x21   :  { %52 = vmatmul.f32.vlgmr.msra.gmra.mxu2 %v16_v28  ;;  %49 = vmatmul.f32.vlgmr.msra.gmra.mxu0 %v15_v29 }
  0x22   :  { %146 = vmatpush.msra.mxu3 %v60_v31  ;;  %87 = vmatpush.msra.mxu1 %v60_v31 }
  0x24   :  { %147 = vmatpush.msra.mxu3 %v59_v32  ;;  %88 = vmatpush.msra.mxu1 %v59_v32 }
  0x26   :  { %148 = vmatpush.msra.mxu3 %v58_v33  ;;  %89 = vmatpush.msra.mxu1 %v58_v33 }
  0x9e   :  { %v50_v34 = vpop.f32.mrf.mxu0 }
  0x9f   :  { %v56_v35 = vmul.f32 %v50_v34, %v50_v34 }
  0xa1   :  { %90 = vmatmul.f32.vlgmr.msra.gmra.mxu1 %v56_v35 }
  0xa4   :  { %v53_v36 = vpop.f32.mrf.mxu2 }
  0xa5   :  { %v57_v37 = vmul.f32 %v53_v36, %v53_v36 }
  0xa7   :  { %93 = vmatmul.f32.vlgmr.msra.gmra.mxu3 %v57_v37 }
 0x11e   :  { %v91_v38 = vpop.f32.mrf.mxu1 }
 0x11f   :  { %97 = vst [vmem:[#allocation2] sm:$0xff] %v91_v38 }
 0x12a   :  { %v94_v39 = vpop.f32.mrf.mxu3 }
 0x12b   :  { %98 = vst [vmem:[#allocation2 + $0x8] sm:$0xff] %v94_v39 }
 0x12c   :  { %111 = dma.vmem_to_hbm [thread:$0]  %s104_s25, 256, %s106_s28, [#allocation3], %s179_s2, %s179_s2, %s180_s29  }
 0x12d   :  { %176 = dma.done.wait [#allocation3], 256  }
 0x12e   :  { %177 = vsyncadd [#allocation3], 4294967040 }
 0x12f   :  { %116 = vsyncpa [#allocation3], 1 }

</bundles_post_ra>
